<compile_context>
chip_gen: v5e
topology: v5e:2x2
jax: 0.10.0
libtpu: 0.0.40
codegen_flags: <defaults>
</compile_context>

<pallas_src>
import functools

import jax
import jax.numpy as jnp
from jax.experimental import pallas as pl
from jax.experimental.pallas import tpu as pltpu


def _round_up(x, m):
    return ((x + m - 1) // m) * m


def _critic_kernel(s_ref, a_ref, w1s_ref, w1a_ref, b1_ref, w2_ref, b2_ref,
                   w3_ref, b3_ref, out_ref):
    """One batch tile of the Critic MLP, entirely in VMEM (transposed layout).

    s_ref   : (ns, TB)      a_ref  : (na, TB)
    w1s_ref : (64, ns)      w1a_ref: (64, na)     b1_ref: (64, 1)
    w2_ref  : (64, 64)      b2_ref : (64, 1)
    w3_ref  : (1, 64)       b3_ref : (1, 1) in SMEM
    out_ref : (1, TB)       lane-dense row of Q-values for this tile
    """
    # Layer 1: concat(s, a) @ W1 == W1_s^T @ s^T + W1_a^T @ a^T (transposed).
    h1 = jnp.dot(w1s_ref[...], s_ref[...], preferred_element_type=jnp.float32)
    h1 = h1 + jnp.dot(w1a_ref[...], a_ref[...],
                      preferred_element_type=jnp.float32)
    h1 = jnp.maximum(h1 + b1_ref[...], 0.0)                      # (64, TB)

    # Layer 2.
    h2 = jnp.dot(w2_ref[...], h1, preferred_element_type=jnp.float32)
    h2 = jnp.maximum(h2 + b2_ref[...], 0.0)                      # (64, TB)

    # Layer 3: (1, 64) @ (64, TB) -> (1, TB); lane-dense, no transpose needed.
    q_row = jnp.dot(w3_ref[...], h2, preferred_element_type=jnp.float32)
    out_ref[...] = (q_row + b3_ref[0, 0]).astype(out_ref.dtype)


def _pick_tiling(batch, max_block_b):
    """Choose (tile_cols, padded_batch, num_tiles).

    - tile width is a multiple of 128 (lane-dense, unmasked stores)
    - tiles are balanced: padding bounded by ~127 rows per tile
    - at least 2 tiles when batch > 256 so v7x can shard across its 2 TCs
    """
    min_tiles = 2 if batch > 256 else 1
    num_tiles = max(min_tiles, pl.cdiv(batch, max_block_b))
    tb = _round_up(pl.cdiv(batch, num_tiles), 128)
    return tb, tb * num_tiles, num_tiles


@functools.partial(jax.jit, static_argnames=("max_block_b",))
def critic_forward(s, a, params, *, max_block_b=4096):
    """Critic forward: tiny glue (transpose/pad/reshape) + one Pallas kernel."""
    w1, b1, w2, b2, w3, b3 = params
    batch, ns = s.shape
    na = a.shape[-1]
    hidden = w2.shape[0]
    d_in = ns + na

    # Pre-transposed weights (tiny, free); W1 split fuses the concat away.
    w1s_t = w1[:ns].T                      # (64, ns)
    w1a_t = w1[ns:].T                      # (64, na)
    b1_col = b1.reshape(-1, 1)             # (64, 1)
    w2_t = w2.T                            # (64, 64)
    b2_col = b2.reshape(-1, 1)             # (64, 1)
    w3_row = w3.reshape(1, -1)             # (1, 64)
    b3_s = b3.reshape(1, 1)                # (1, 1), SMEM scalar

    tb, b_pad, num_tiles = _pick_tiling(batch, max_block_b)

    # Transposed, lane-major inputs (ns, B_pad) / (na, B_pad): no 128-lane
    # padding of the narrow feature dim, and the batch axis is lane-dense.
    pad = b_pad - batch
    s_t = jnp.pad(s.T, ((0, 0), (0, pad)))
    a_t = jnp.pad(a.T, ((0, 0), (0, pad)))

    def const_spec(arr):
        return pl.BlockSpec(arr.shape, lambda i: (0, 0))

    flops = 2 * b_pad * (d_in * hidden + hidden * hidden + hidden)
    bytes_accessed = 4 * (b_pad * (d_in + 1)
                          + d_in * hidden + hidden * hidden
                          + 2 * hidden + hidden + 1)

    out = pl.pallas_call(
        _critic_kernel,
        out_shape=jax.ShapeDtypeStruct((1, b_pad), jnp.float32),
        grid=(num_tiles,),
        in_specs=[
            pl.BlockSpec((ns, tb), lambda i: (0, i)),    # s^T tile
            pl.BlockSpec((na, tb), lambda i: (0, i)),    # a^T tile
            const_spec(w1s_t), const_spec(w1a_t), const_spec(b1_col),
            const_spec(w2_t), const_spec(b2_col),
            const_spec(w3_row),
            pl.BlockSpec((1, 1), lambda i: (0, 0),
                         memory_space=pltpu.MemorySpace.SMEM),   # b3 scalar
        ],
        out_specs=pl.BlockSpec((1, tb), lambda i: (0, i)),
        compiler_params=pltpu.CompilerParams(
            dimension_semantics=("parallel",),
            vmem_limit_bytes=32 * 1024 * 1024),
        cost_estimate=pl.CostEstimate(
            flops=flops, transcendentals=0, bytes_accessed=bytes_accessed),
    )(s_t, a_t, w1s_t, w1a_t, b1_col, w2_t, b2_col, w3_row, b3_s)

    # (1, B_pad) lane-dense slab -> (B, 1); tiny glue op on the output only.
    return out.reshape(-1)[:batch].reshape(batch, 1)


def init_critic_params(key, num_states, num_actions):
    """PyTorch-style init: U(-1/sqrt(fan_in), 1/sqrt(fan_in)).

    Weights stored as (in_features, out_features) so forward is x @ W + b.
    """
    dims = [(num_states + num_actions, 64), (64, 64), (64, 1)]
    params = []
    for fan_in, fan_out in dims:
        key, kw, kb = jax.random.split(key, 3)
        bound = 1.0 / jnp.sqrt(jnp.float32(fan_in))
        w = jax.random.uniform(kw, (fan_in, fan_out), jnp.float32,
                               minval=-bound, maxval=bound)
        b = jax.random.uniform(kb, (1, fan_out), jnp.float32,
                               minval=-bound, maxval=bound)
        params.extend([w, b])
    return tuple(params)


def critic_reference(s, a, params):
    """Pure-JAX reference for correctness checking."""
    w1, b1, w2, b2, w3, b3 = params
    x = jnp.concatenate([s, a], axis=-1)
    x = jax.nn.relu(x @ w1 + b1)
    x = jax.nn.relu(x @ w2 + b2)
    return x @ w3 + b3


if __name__ == "__main__":
    num_states = 12
    num_actions = 4

    key = jax.random.PRNGKey(0)
    key, ks, ka, kp = jax.random.split(key, 4)
    params = init_critic_params(kp, num_states, num_actions)

    # Small single-tile check (batch pads up to one lane-dense 128-wide tile).
    batch = 8
    s = jax.random.normal(ks, (batch, num_states), jnp.float32)
    a = jax.random.normal(ka, (batch, num_actions), jnp.float32)
    q = critic_forward(s, a, params)
    jax.block_until_ready(q)
    q_ref = critic_reference(s, a, params)
    assert q.shape == (batch, 1), q.shape
    assert jnp.allclose(q, q_ref, atol=1e-4, rtol=1e-4)

    # Multi-tile + balanced-padding + dual-TC path (300 rows -> 3 tiles of 128).
    batch2 = 300
    key, ks2, ka2 = jax.random.split(key, 3)
    s2 = jax.random.normal(ks2, (batch2, num_states), jnp.float32)
    a2 = jax.random.normal(ka2, (batch2, num_actions), jnp.float32)
    q2 = critic_forward(s2, a2, params, max_block_b=128)
    jax.block_until_ready(q2)
    q2_ref = critic_reference(s2, a2, params)
    assert q2.shape == (batch2, 1), q2.shape
    assert jnp.allclose(q2, q2_ref, atol=1e-4, rtol=1e-4)

    print("KERNEL_OK")
</pallas_src>

<mosaic_0001>
module attributes {stable_mosaic.version = 11 : i64} {
  func.func @_critic_kernel(%arg0: i32, %arg1: memref<12x128xf32, #tpu.memory_space<vmem>>, %arg2: memref<4x128xf32, #tpu.memory_space<vmem>>, %arg3: memref<64x12xf32, #tpu.memory_space<vmem>>, %arg4: memref<64x4xf32, #tpu.memory_space<vmem>>, %arg5: memref<64x1xf32, #tpu.memory_space<vmem>>, %arg6: memref<64x64xf32, #tpu.memory_space<vmem>>, %arg7: memref<64x1xf32, #tpu.memory_space<vmem>>, %arg8: memref<1x64xf32, #tpu.memory_space<vmem>>, %arg9: memref<1x1xf32, #tpu.memory_space<smem>>, %arg10: memref<1x128xf32, #tpu.memory_space<vmem>>) attributes {dimension_semantics = [#tpu.dimension_semantics<parallel>], iteration_bounds = array<i64: 1>, scalar_prefetch = 0 : i64, scratch_operands = 0 : i64, tpu.core_type = #tpu.core_type<tc>, window_params = [{transform_indices = @transform_0, window_bounds = array<i64: 12, 128>}, {transform_indices = @transform_1, window_bounds = array<i64: 4, 128>}, {pipeline_mode = #tpu.pipeline_mode<synchronous>, transform_indices = @transform_2, window_bounds = array<i64: 64, 12>}, {pipeline_mode = #tpu.pipeline_mode<synchronous>, transform_indices = @transform_3, window_bounds = array<i64: 64, 4>}, {pipeline_mode = #tpu.pipeline_mode<synchronous>, transform_indices = @transform_4, window_bounds = array<i64: 64, 1>}, {pipeline_mode = #tpu.pipeline_mode<synchronous>, transform_indices = @transform_5, window_bounds = array<i64: 64, 64>}, {pipeline_mode = #tpu.pipeline_mode<synchronous>, transform_indices = @transform_6, window_bounds = array<i64: 64, 1>}, {pipeline_mode = #tpu.pipeline_mode<synchronous>, transform_indices = @transform_7, window_bounds = array<i64: 1, 64>}, {transform_indices = @transform_8, window_bounds = array<i64: 1, 1>}, {transform_indices = @transform_9, window_bounds = array<i64: 1, 128>}]} {
    %c0 = arith.constant 0 : index
    %c0_0 = arith.constant 0 : index
    %0 = vector.load %arg3[%c0, %c0_0] : memref<64x12xf32, #tpu.memory_space<vmem>>, vector<64x12xf32>
    %c0_1 = arith.constant 0 : index
    %c0_2 = arith.constant 0 : index
    %1 = vector.load %arg1[%c0_1, %c0_2] : memref<12x128xf32, #tpu.memory_space<vmem>>, vector<12x128xf32>
    %cst = arith.constant dense<0.000000e+00> : vector<64x128xf32>
    %2 = tpu.matmul %0, %1, %cst {dimension_numbers = #tpu.dot_dimension_numbers<[1], [0], [0], [1], [0, 0, 1, 1], [], []>} : vector<64x12xf32>, vector<12x128xf32>, vector<64x128xf32> -> vector<64x128xf32>
    %c0_3 = arith.constant 0 : index
    %c0_4 = arith.constant 0 : index
    %3 = vector.load %arg4[%c0_3, %c0_4] : memref<64x4xf32, #tpu.memory_space<vmem>>, vector<64x4xf32>
    %c0_5 = arith.constant 0 : index
    %c0_6 = arith.constant 0 : index
    %4 = vector.load %arg2[%c0_5, %c0_6] : memref<4x128xf32, #tpu.memory_space<vmem>>, vector<4x128xf32>
    %cst_7 = arith.constant dense<0.000000e+00> : vector<64x128xf32>
    %5 = tpu.matmul %3, %4, %cst_7 {dimension_numbers = #tpu.dot_dimension_numbers<[1], [0], [0], [1], [0, 0, 1, 1], [], []>} : vector<64x4xf32>, vector<4x128xf32>, vector<64x128xf32> -> vector<64x128xf32>
    %6 = arith.addf %2, %5 : vector<64x128xf32>
    %c0_8 = arith.constant 0 : index
    %c0_9 = arith.constant 0 : index
    %7 = vector.load %arg5[%c0_8, %c0_9] : memref<64x1xf32, #tpu.memory_space<vmem>>, vector<64x1xf32>
    %8 = vector.broadcast %7 : vector<64x1xf32> to vector<64x128xf32>
    %9 = arith.addf %6, %8 : vector<64x128xf32>
    %cst_10 = arith.constant 0.000000e+00 : f32
    %10 = vector.broadcast %cst_10 : f32 to vector<64x128xf32>
    %11 = arith.maximumf %9, %10 : vector<64x128xf32>
    %c0_11 = arith.constant 0 : index
    %c0_12 = arith.constant 0 : index
    %12 = vector.load %arg6[%c0_11, %c0_12] : memref<64x64xf32, #tpu.memory_space<vmem>>, vector<64x64xf32>
    %cst_13 = arith.constant dense<0.000000e+00> : vector<64x128xf32>
    %13 = tpu.matmul %12, %11, %cst_13 {dimension_numbers = #tpu.dot_dimension_numbers<[1], [0], [0], [1], [0, 0, 1, 1], [], []>} : vector<64x64xf32>, vector<64x128xf32>, vector<64x128xf32> -> vector<64x128xf32>
    %c0_14 = arith.constant 0 : index
    %c0_15 = arith.constant 0 : index
    %14 = vector.load %arg7[%c0_14, %c0_15] : memref<64x1xf32, #tpu.memory_space<vmem>>, vector<64x1xf32>
    %15 = vector.broadcast %14 : vector<64x1xf32> to vector<64x128xf32>
    %16 = arith.addf %13, %15 : vector<64x128xf32>
    %cst_16 = arith.constant 0.000000e+00 : f32
    %17 = vector.broadcast %cst_16 : f32 to vector<64x128xf32>
    %18 = arith.maximumf %16, %17 : vector<64x128xf32>
    %c0_17 = arith.constant 0 : index
    %c0_18 = arith.constant 0 : index
    %19 = vector.load %arg8[%c0_17, %c0_18] : memref<1x64xf32, #tpu.memory_space<vmem>>, vector<1x64xf32>
    %cst_19 = arith.constant dense<0.000000e+00> : vector<1x128xf32>
    %20 = tpu.matmul %19, %18, %cst_19 {dimension_numbers = #tpu.dot_dimension_numbers<[1], [0], [0], [1], [0, 0, 1, 1], [], []>} : vector<1x64xf32>, vector<64x128xf32>, vector<1x128xf32> -> vector<1x128xf32>
    %c0_20 = arith.constant 0 : index
    %c0_21 = arith.constant 0 : index
    %21 = memref.load %arg9[%c0_20, %c0_21] : memref<1x1xf32, #tpu.memory_space<smem>>
    %22 = vector.broadcast %21 : f32 to vector<1x128xf32>
    %23 = arith.addf %20, %22 : vector<1x128xf32>
    %c0_22 = arith.constant 0 : index
    %c0_23 = arith.constant 0 : index
    %24 = vector.load %arg10[%c0_22, %c0_23] : memref<1x128xf32, #tpu.memory_space<vmem>>, vector<1x128xf32>
    tpu.vector_store %arg10[%c0_22, %c0_23], %23 {strides = array<i32>} : memref<1x128xf32, #tpu.memory_space<vmem>>, vector<1x128xf32>,
    return
  }
  func.func @transform_0(%arg0: i32) -> (i32, i32) {
    %c0_i32 = arith.constant 0 : i32
    %c0_i32_0 = arith.constant 0 : i32
    return %c0_i32, %arg0 : i32, i32
  }
  func.func @transform_1(%arg0: i32) -> (i32, i32) {
    %c0_i32 = arith.constant 0 : i32
    %c0_i32_0 = arith.constant 0 : i32
    return %c0_i32, %arg0 : i32, i32
  }
  func.func @transform_2(%arg0: i32) -> (i32, i32) {
    %c0_i32 = arith.constant 0 : i32
    %c0_i32_0 = arith.constant 0 : i32
    %c0_i32_1 = arith.constant 0 : i32
    return %c0_i32, %c0_i32_0 : i32, i32
  }
  func.func @transform_3(%arg0: i32) -> (i32, i32) {
    %c0_i32 = arith.constant 0 : i32
    %c0_i32_0 = arith.constant 0 : i32
    %c0_i32_1 = arith.constant 0 : i32
    return %c0_i32, %c0_i32_0 : i32, i32
  }
  func.func @transform_4(%arg0: i32) -> (i32, i32) {
    %c0_i32 = arith.constant 0 : i32
    %c0_i32_0 = arith.constant 0 : i32
    %c0_i32_1 = arith.constant 0 : i32
    return %c0_i32, %c0_i32_0 : i32, i32
  }
  func.func @transform_5(%arg0: i32) -> (i32, i32) {
    %c0_i32 = arith.constant 0 : i32
    %c0_i32_0 = arith.constant 0 : i32
    %c0_i32_1 = arith.constant 0 : i32
    return %c0_i32, %c0_i32_0 : i32, i32
  }
  func.func @transform_6(%arg0: i32) -> (i32, i32) {
    %c0_i32 = arith.constant 0 : i32
    %c0_i32_0 = arith.constant 0 : i32
    %c0_i32_1 = arith.constant 0 : i32
    return %c0_i32, %c0_i32_0 : i32, i32
  }
  func.func @transform_7(%arg0: i32) -> (i32, i32) {
    %c0_i32 = arith.constant 0 : i32
    %c0_i32_0 = arith.constant 0 : i32
    %c0_i32_1 = arith.constant 0 : i32
    return %c0_i32, %c0_i32_0 : i32, i32
  }
  func.func @transform_8(%arg0: i32) -> (i32, i32) {
    %c0_i32 = arith.constant 0 : i32
    %c0_i32_0 = arith.constant 0 : i32
    %c0_i32_1 = arith.constant 0 : i32
    return %c0_i32, %c0_i32_0 : i32, i32
  }
  func.func @transform_9(%arg0: i32) -> (i32, i32) {
    %c0_i32 = arith.constant 0 : i32
    %c0_i32_0 = arith.constant 0 : i32
    return %c0_i32, %arg0 : i32, i32
  }
}

</mosaic_0001>

<bundles_post_ra>
// kernel: critic_forward.1
= control target key start
LH: loop header
LB: loop body
LE: loop exit
PB: predicated region body
PF: predicated region fallthrough
CT: control target
= control target key end

     0   :  { %vm77_vm0 = vcmask 1043456   ;;  %v455_v0 = vmov 0   ;;  %vm52_vm1 = vcmask 31744   ;;  %vm122_vm2 = vcmask 97280   ;;  %s671_s4 = inlined_call_operand.vmem [shape: f32[64,1], index: 4, kind: input, shape index: {}]   ;;  %s672_s0 = inlined_call_operand.vmem [shape: f32[12,128], index: 0, kind: input, shape index: {}]   ;;  %s673_s1 = inlined_call_operand.vmem [shape: f32[4,128], index: 1, kind: input, shape index: {}]   ;;  %s674_s3 = inlined_call_operand.vmem [shape: f32[64,4], index: 3, kind: input, shape index: {}]   ;;  %s675_s2 = inlined_call_operand.vmem [shape: f32[64,12], index: 2, kind: input, shape index: {}]   ;;  %s676_s6 = inlined_call_operand.vmem [shape: f32[64,1], index: 6, kind: input, shape index: {}]   ;;  %s677_s5 = inlined_call_operand.vmem [shape: f32[64,64], index: 5, kind: input, shape index: {}]   ;;  %s678_s7 = inlined_call_operand.vmem [shape: f32[1,64], index: 7, kind: input, shape index: {}]   ;;  %s679_s8 = inlined_call_operand.<no memory space> [shape: f32[1,1], index: 8, kind: input, shape index: {}]   ;;  %s680_s9 = inlined_call_operand.vmem [shape: f32[1,128], index: 9, kind: output, shape index: {}]  }
   0x1   :  { %453 = vset.pattern.permute.xlu1 %v455_v0  ;;  %v196_v1 = vld [vmem:[%s671_s4 + $0x28] sm:$0xff]  ;;  %v51_v3 = vld [vmem:[%s673_s1] sm:$0xf]  ;;  %452 = vset.pattern.permute.xlu0 %v455_v0  ;;  %v198_v7 = vld [vmem:[%s671_s4 + $0x38] sm:$0xff]  ;;  %vm311_vm3 = vcmask 523264  }
   0x2   :  { %v42_v2 = vld [vmem:[%s672_s0 + $0x8] sm:$0xf]  ;;  %226 = vperm.xlu1 %453, %v196_v1   ;;  %v41_v4 = vld [vmem:[%s672_s0] sm:$0xff]  ;;  %416 = vmatpush.msk.msra.mxu0 %vm77_vm0, %v51_v3  ;;  %v197_v11 = vld [vmem:[%s671_s4 + $0x30] sm:$0xff] }
   0x3   :  { %425 = vmatpush.msk.msra.mxu1 %vm77_vm0, %v42_v2  ;;  %v43_v5 = vld [vmem:[%s674_s3] sm:$0xff]  ;;  %454 = vset.pattern.permute.xlu2 %v455_v0  ;;  %v44_v9 = vld [vmem:[%s674_s3 + $0x8] sm:$0xff]  ;;  %v194_v12 = vld [vmem:[%s671_s4 + $0x18] sm:$0xff] }
   0x4   :  { %v33_v6 = vld [vmem:[%s675_s2] sm:$0xff]  ;;  %417 = vmatmul.msk.f32.vlgmr.msra.gmra.mxu0 %vm52_vm1, %v43_v5  ;;  %236 = vperm.xlu0 %452, %v198_v7   ;;  %v34_v10 = vld [vmem:[%s675_s2 + $0x8] sm:$0xff]  ;;  %v45_v14 = vld [vmem:[%s674_s3 + $0x10] sm:$0xff] }
   0x5   :  { %165 = vmatpush.msra.mxu1 %v41_v4  ;;  %v195_v8 = vld [vmem:[%s671_s4 + $0x20] sm:$0xff]  ;;  %216 = vperm.xlu2 %454, %v194_v12   ;;  %v35_v15 = vld [vmem:[%s675_s2 + $0x10] sm:$0xff]  ;;  %v192_v16 = vld [vmem:[%s671_s4 + $0x8] sm:$0xff] }
   0x6   :  { %426 = vmatmul.msk.f32.vlgmr.msra.gmra.mxu1 %vm122_vm2, %v33_v6  ;;  %v191_v13 = vld [vmem:[%s671_s4] sm:$0xff]  ;;  %v193_v17 = vld [vmem:[%s671_s4 + $0x10] sm:$0xff]  ;;  %v46_v18 = vld [vmem:[%s674_s3 + $0x18] sm:$0xff] }
   0x7   :  { %v36_v19 = vld [vmem:[%s675_s2 + $0x18] sm:$0xff]  ;;  %v269_v20 = vld [vmem:[%s676_s6 + $0x30] sm:$0xff]  ;;  %v268_v21 = vld [vmem:[%s676_s6 + $0x28] sm:$0xff] }
   0x8   :  { %v270_v22 = vld [vmem:[%s676_s6 + $0x38] sm:$0xff]  ;;  %v47_v23 = vld [vmem:[%s674_s3 + $0x20] sm:$0xff]  ;;  %v265_v26 = vld [vmem:[%s676_s6 + $0x10] sm:$0xff] }
   0x9   :  { %v37_v24 = vld [vmem:[%s675_s2 + $0x20] sm:$0xff]  ;;  %v266_v25 = vld [vmem:[%s676_s6 + $0x18] sm:$0xff]  ;;  %v48_v28 = vld [vmem:[%s674_s3 + $0x28] sm:$0xff] }
   0xa   :  { %221 = vperm.xlu1 %453, %v195_v8   ;;  %v267_v27 = vld [vmem:[%s676_s6 + $0x20] sm:$0xff]  ;;  %v38_v29 = vld [vmem:[%s675_s2 + $0x28] sm:$0xff]  ;;  %v49_v32 = vld [vmem:[%s674_s3 + $0x30] sm:$0xff] }
   0xb   :  { %v263_v30 = vld [vmem:[%s676_s6] sm:$0xff]  ;;  %v264_v31 = vld [vmem:[%s676_s6 + $0x8] sm:$0xff]  ;;  %v39_v33 = vld [vmem:[%s675_s2 + $0x30] sm:$0xff] }
   0xc   :  { %418 = vmatmul.msk.f32.gmra.mxu0 %vm52_vm1, %v44_v9  ;;  %231 = vperm.xlu0 %452, %v197_v11   ;;  %v50_v34 = vld [vmem:[%s674_s3 + $0x38] sm:$0xff] }
   0xd   :  { %211 = vperm.xlu2 %454, %v193_v17   ;;  %v40_v35 = vld [vmem:[%s675_s2 + $0x38] sm:$0xff] }
   0xe   :  { %427 = vmatmul.msk.f32.gmra.mxu1 %vm122_vm2, %v34_v10 }
  0x12   :  { %201 = vperm.xlu1 %453, %v191_v13  }
  0x14   :  { %419 = vmatmul.msk.f32.gmra.mxu0 %vm52_vm1, %v45_v14  ;;  %206 = vperm.xlu0 %452, %v192_v16  }
  0x15   :  { %308 = vperm.xlu2 %454, %v270_v22   ;;  %v256_v22 = vld [vmem:[%s677_s5 + $0x8] sm:$0xff] }
  0x16   :  { %428 = vmatmul.msk.f32.gmra.mxu1 %vm122_vm2, %v35_v15 }
  0x1a   :  { %298 = vperm.xlu1 %453, %v268_v21   ;;  %v261_v21 = vld [vmem:[%s677_s5 + $0x30] sm:$0xff] }
  0x1c   :  { %420 = vmatmul.msk.f32.gmra.mxu0 %vm52_vm1, %v46_v18  ;;  %303 = vperm.xlu0 %452, %v269_v20   ;;  %v255_v20 = vld [vmem:[%s677_s5] sm:$0xff] }
  0x1d   :  { %293 = vperm.xlu2 %454, %v267_v27   ;;  %v260_v27 = vld [vmem:[%s677_s5 + $0x28] sm:$0xff] }
  0x1e   :  { %429 = vmatmul.msk.f32.gmra.mxu1 %vm122_vm2, %v36_v19 }
  0x22   :  { %283 = vperm.xlu1 %453, %v265_v26   ;;  %v259_v26 = vld [vmem:[%s677_s5 + $0x20] sm:$0xff] }
  0x24   :  { %421 = vmatmul.msk.f32.gmra.mxu0 %vm52_vm1, %v47_v23  ;;  %288 = vperm.xlu0 %452, %v266_v25   ;;  %v262_v23 = vld [vmem:[%s677_s5 + $0x38] sm:$0xff] }
  0x25   :  { %278 = vperm.xlu2 %454, %v264_v31   ;;  %v258_v25 = vld [vmem:[%s677_s5 + $0x18] sm:$0xff] }
  0x26   :  { %430 = vmatmul.msk.f32.gmra.mxu1 %vm122_vm2, %v37_v24  ;;  %v257_v24 = vld [vmem:[%s677_s5 + $0x10] sm:$0xff] }
  0x2c   :  { %422 = vmatmul.msk.f32.gmra.mxu0 %vm52_vm1, %v48_v28  ;;  %273 = vperm.xlu0 %452, %v263_v30  }
  0x2e   :  { %431 = vmatmul.msk.f32.gmra.mxu1 %vm122_vm2, %v38_v29 }
  0x34   :  { %423 = vmatmul.msk.f32.gmra.mxu0 %vm52_vm1, %v49_v32 }
  0x36   :  { %432 = vmatmul.msk.f32.gmra.mxu1 %vm122_vm2, %v39_v33 }
  0x3c   :  { %424 = vmatmul.msk.f32.gmra.mxu0 %vm52_vm1, %v50_v34 }
  0x3e   :  { %433 = vmatmul.msk.f32.gmra.mxu1 %vm122_vm2, %v40_v35 }
  0x5f   :  { %v217_v53 = vpop.permute.xlu2 %216 }
  0x67   :  { %v212_v6 = vpop.permute.xlu2 %211 }
  0x6f   :  { %v309_v31 = vpop.permute.xlu2 %308 }
  0x74   :  { %v227_v51 = vpop.permute.xlu1 %226 }
  0x76   :  { %v237_v49 = vpop.permute.xlu0 %236 }
  0x7c   :  { %v222_v60 = vpop.permute.xlu1 %221 }
  0x7e   :  { %v232_v56 = vpop.permute.xlu0 %231 }
  0x81   :  { %v98_v36 = vpop.f32.mrf.mxu0 }
  0x83   :  { %v167_v37 = vpop.f32.mrf.mxu1 }
  0x84   :  { %v168_v38 = vadd.f32 %v167_v37, %v98_v36  ;;  %v202_v13 = vpop.permute.xlu1 %201 }
  0x86   :  { %v207_v10 = vpop.permute.xlu0 %206  ;;  %v239_v16 = vadd.f32 %v202_v13, %v168_v38 }
  0x88   :  { %v247_v19 = vmax.f32 %v239_v16, 0.0 }
  0x89   :  { %v101_v39 = vpop.f32.mrf.mxu0 }
  0x8b   :  { %v170_v40 = vpop.f32.mrf.mxu1 }
  0x8c   :  { %v171_v7 = vadd.f32 %v170_v40, %v101_v39 }
  0x8e   :  { %v240_v14 = vadd.f32 %v207_v10, %v171_v7  ;;  %v304_v30 = vpop.permute.xlu0 %303 }
  0x90   :  { %v248_v18 = vmax.f32 %v240_v14, 0.0 }
  0x91   :  { %v104_v41 = vpop.f32.mrf.mxu0 }
  0x93   :  { %v173_v42 = vpop.f32.mrf.mxu1 }
  0x94   :  { %v174_v3 = vadd.f32 %v173_v42, %v104_v41  ;;  %v299_v41 = vpop.permute.xlu1 %298  ;;  %v294_v42 = vpop.permute.xlu2 %293 }
  0x96   :  { %v241_v11 = vadd.f32 %v212_v6, %v174_v3 }
  0x98   :  { %v249_v17 = vmax.f32 %v241_v11, 0.0 }
  0x99   :  { %v107_v43 = vpop.f32.mrf.mxu0 }
  0x9b   :  { %v176_v44 = vpop.f32.mrf.mxu1 }
  0x9c   :  { %v177_v0 = vadd.f32 %v176_v44, %v107_v43  ;;  %v289_v43 = vpop.permute.xlu0 %288 }
  0x9e   :  { %v242_v9 = vadd.f32 %v217_v53, %v177_v0 }
  0xa0   :  { %v250_v15 = vmax.f32 %v242_v9, 0.0 }
  0xa1   :  { %v110_v45 = vpop.f32.mrf.mxu0 }
  0xa3   :  { %v179_v46 = vpop.f32.mrf.mxu1 }
  0xa4   :  { %v180_v61 = vadd.f32 %v179_v46, %v110_v45 }
  0xa6   :  { %v243_v5 = vadd.f32 %v222_v60, %v180_v61  ;;  %v385_v60 = vld [vmem:[%s678_s7] sm:$0x1]  ;;  %v387_v61 = vstv %s679_s8 }
  0xa8   :  { %v251_v12 = vmax.f32 %v243_v5, 0.0 }
  0xa9   :  { %v113_v47 = vpop.f32.mrf.mxu0 }
  0xab   :  { %v182_v48 = vpop.f32.mrf.mxu1 }
  0xac   :  { %v183_v58 = vadd.f32 %v182_v48, %v113_v47 }
  0xae   :  { %v244_v2 = vadd.f32 %v227_v51, %v183_v58 }
  0xb0   :  { %v252_v8 = vmax.f32 %v244_v2, 0.0 }
  0xb1   :  { %v116_v50 = vpop.f32.mrf.mxu0 }
  0xb3   :  { %v185_v52 = vpop.f32.mrf.mxu1 }
  0xb4   :  { %v186_v54 = vadd.f32 %v185_v52, %v116_v50  ;;  %v279_v52 = vpop.permute.xlu2 %278 }
  0xb6   :  { %v245_v63 = vadd.f32 %v232_v56, %v186_v54 }
  0xb8   :  { %v253_v4 = vmax.f32 %v245_v63, 0.0 }
  0xb9   :  { %v119_v55 = vpop.f32.mrf.mxu0 }
  0xbb   :  { %v188_v57 = vpop.f32.mrf.mxu1 }
  0xbc   :  { %v189_v59 = vadd.f32 %v188_v57, %v119_v55  ;;  %v274_v55 = vpop.permute.xlu0 %273 }
  0xbe   :  { %v246_v62 = vadd.f32 %v237_v49, %v189_v59  ;;  %v284_v49 = vpop.permute.xlu1 %283 }
  0xc0   :  { %v254_v1 = vmax.f32 %v246_v62, 0.0 }
  0xc2   :  { %344 = vmatpush.msra.mxu2 %v254_v1  ;;  %443 = vmatpush.msra.mxu3 %v254_v1 }
  0xc4   :  { %345 = vmatpush.msra.mxu2 %v253_v4  ;;  %444 = vmatpush.msra.mxu3 %v253_v4 }
  0xc6   :  { %346 = vmatpush.msra.mxu2 %v252_v8  ;;  %445 = vmatpush.msra.mxu3 %v252_v8 }
  0xc8   :  { %347 = vmatpush.msra.mxu2 %v251_v12  ;;  %446 = vmatpush.msra.mxu3 %v251_v12 }
  0xca   :  { %348 = vmatpush.msra.mxu2 %v250_v15  ;;  %447 = vmatpush.msra.mxu3 %v250_v15 }
  0xcc   :  { %349 = vmatpush.msra.mxu2 %v249_v17  ;;  %448 = vmatpush.msra.mxu3 %v249_v17 }
  0xce   :  { %350 = vmatpush.msra.mxu2 %v248_v18  ;;  %449 = vmatpush.msra.mxu3 %v248_v18 }
  0xd0   :  { %351 = vmatpush.msra.mxu2 %v247_v19  ;;  %450 = vmatpush.msra.mxu3 %v247_v19 }
  0xd1   :  { %434 = vmatmul.msk.f32.vlgmr.msra.gmra.mxu2 %vm311_vm3, %v255_v20  ;;  %440 = vmatmul.msk.f32.vlgmr.msra.gmra.mxu3 %vm311_vm3, %v261_v21 }
  0xd9   :  { %435 = vmatmul.msk.f32.gmra.mxu2 %vm311_vm3, %v256_v22  ;;  %441 = vmatmul.msk.f32.gmra.mxu3 %vm311_vm3, %v262_v23 }
  0xe1   :  { %436 = vmatmul.msk.f32.gmra.mxu2 %vm311_vm3, %v257_v24 }
  0xe9   :  { %437 = vmatmul.msk.f32.gmra.mxu2 %vm311_vm3, %v258_v25 }
  0xf1   :  { %438 = vmatmul.msk.f32.gmra.mxu2 %vm311_vm3, %v259_v26 }
  0xf9   :  { %439 = vmatmul.msk.f32.gmra.mxu2 %vm311_vm3, %v260_v27 }
 0x154   :  { %v353_v28 = vpop.f32.mrf.mxu2  ;;  %v371_v29 = vpop.f32.mrf.mxu3 }
 0x155   :  { %v372_v34 = vadd.f32 %v371_v29, %v304_v30  ;;  %v354_v56 = vadd.f32 %v353_v28, %v274_v55 }
 0x157   :  { %v383_v37 = vmax.f32 %v372_v34, 0.0  ;;  %v377_v59 = vmax.f32 %v354_v56, 0.0 }
 0x15c   :  { %v356_v32 = vpop.f32.mrf.mxu2  ;;  %v374_v33 = vpop.f32.mrf.mxu3 }
 0x15d   :  { %v375_v35 = vadd.f32 %v374_v33, %v309_v31  ;;  %v357_v53 = vadd.f32 %v356_v32, %v279_v52 }
 0x15f   :  { %v384_v36 = vmax.f32 %v375_v35, 0.0  ;;  %v378_v58 = vmax.f32 %v357_v53, 0.0 }
 0x161   :  { %399 = vmatpush.msrb.mxu3 %v384_v36 }
 0x163   :  { %400 = vmatpush.msrb.mxu3 %v383_v37 }
 0x164   :  { %v359_v38 = vpop.f32.mrf.mxu2 }
 0x165   :  { %v360_v50 = vadd.f32 %v359_v38, %v284_v49 }
 0x167   :  { %v379_v57 = vmax.f32 %v360_v50, 0.0 }
 0x16c   :  { %v362_v39 = vpop.f32.mrf.mxu2 }
 0x16d   :  { %v363_v47 = vadd.f32 %v362_v39, %v289_v43 }
 0x16f   :  { %v380_v54 = vmax.f32 %v363_v47, 0.0 }
 0x174   :  { %v365_v40 = vpop.f32.mrf.mxu2 }
 0x175   :  { %v366_v45 = vadd.f32 %v365_v40, %v294_v42 }
 0x177   :  { %v381_v51 = vmax.f32 %v366_v45, 0.0 }
 0x17c   :  { %v368_v44 = vpop.f32.mrf.mxu2 }
 0x17d   :  { %v369_v46 = vadd.f32 %v368_v44, %v299_v41 }
 0x17f   :  { %v382_v48 = vmax.f32 %v369_v46, 0.0 }
 0x181   :  { %401 = vmatpush.msrb.mxu3 %v382_v48 }
 0x183   :  { %402 = vmatpush.msrb.mxu3 %v381_v51 }
 0x185   :  { %403 = vmatpush.msrb.mxu3 %v380_v54 }
 0x187   :  { %404 = vmatpush.msrb.mxu3 %v379_v57 }
 0x189   :  { %405 = vmatpush.msrb.mxu3 %v378_v58 }
 0x18b   :  { %406 = vmatpush.msrb.mxu3 %v377_v59 }
 0x18c   :  { %442 = vmatmul.msk.f32.vlgmr.msrb.gmra.mxu3 %vm311_vm3, %v385_v60 }
 0x20f   :  { %v408_v62 = vpop.f32.mrf.mxu3 }
 0x210   :  { %v409_v63 = vadd.f32 %v408_v62, %v387_v61 }
 0x212   :  { %411 = vst [vmem:[%s680_s9] sm:$0x1] %v409_v63 }

</bundles_post_ra>
